<compile_context>
chip_gen: v7x
topology: tpu7x:2x2x1
jax: 0.10.0
libtpu: 0.0.40
codegen_flags: <defaults>
</compile_context>

<pallas_src>
import jax
import jax.numpy as jnp
from jax.experimental import pallas as pl
from jax.experimental.pallas import tpu as pltpu

IN_F = 100   # Linear in_features
OUT_F = 10   # Linear out_features


def linear_kernel(x_ref, w_ref, b_ref, o_ref):
    # x_ref: [tb, 100]  w_ref: [100, 10]  b_ref: [1, 10]  o_ref: [tb, 10]
    acc = jnp.dot(x_ref[...], w_ref[...], preferred_element_type=jnp.float32)
    o_ref[...] = (acc + b_ref[...]).astype(o_ref.dtype)


def _round_up(n, m):
    return ((n + m - 1) // m) * m


def prepare_params(w_torch, b):
    """One-time parameter layout prep (hoisted out of the per-call path).

    w_torch: [10, 100] (torch nn.Linear layout), b: [10]
    returns (w_kernel [100, 10] f32, b_kernel [1, 10] f32)
    """
    w_kernel = jnp.asarray(w_torch, jnp.float32).T          # [IN_F, OUT_F]
    b_kernel = jnp.asarray(b, jnp.float32).reshape(1, OUT_F)
    return w_kernel, b_kernel


def _pick_tile(B, block_b):
    # Multiple of 8 (sublane), capped by block_b.
    tb = _round_up(min(block_b, B), 8)
    # Large batches: keep at least 2 grid steps so both v7x TensorCores work.
    if B >= 16 and pl.cdiv(B, tb) < 2:
        tb = _round_up(pl.cdiv(B, 2), 8)
    return max(tb, 8)


def torchnet_forward(x, w_kernel, b_kernel, *, block_b=8192):
    """x: [B, 100] f32, w_kernel: [100, 10] f32, b_kernel: [1, 10] f32 -> [B, 10]."""
    B = x.shape[0]
    dtype = x.dtype
    tb = _pick_tile(B, block_b)
    grid = (pl.cdiv(B, tb),)

    return pl.pallas_call(
        linear_kernel,
        out_shape=jax.ShapeDtypeStruct((B, OUT_F), dtype),
        grid_spec=pltpu.PrefetchScalarGridSpec(
            num_scalar_prefetch=0,
            grid=grid,
            in_specs=[
                # x: batch-tiled, double-buffered by the Pallas pipeline.
                # Last dim is the full array extent (100), so no padding needed.
                pl.BlockSpec((tb, IN_F), lambda i: (i, 0)),
                # Weight + bias: constant index_map -> VMEM-resident across tiles.
                pl.BlockSpec((IN_F, OUT_F), lambda i: (0, 0)),
                pl.BlockSpec((1, OUT_F), lambda i: (0, 0)),
            ],
            out_specs=pl.BlockSpec((tb, OUT_F), lambda i: (i, 0)),
        ),
        compiler_params=pltpu.CompilerParams(
            # Independent batch tiles: shard across both TensorCores on v7x.
            dimension_semantics=("parallel",),
        ),
    )(x, w_kernel, b_kernel)


if __name__ == "__main__":
    key = jax.random.PRNGKey(0)
    k_x, k_w, k_b = jax.random.split(key, 3)

    B, IN, OUT = 8, 100, 10

    # Deterministic parameter init mimicking torch.nn.Linear default:
    # uniform(-1/sqrt(in_features), 1/sqrt(in_features)).
    bound = 1.0 / jnp.sqrt(jnp.float32(IN))
    w = jax.random.uniform(k_w, (OUT, IN), jnp.float32, -bound, bound)  # torch layout [10, 100]
    b = jax.random.uniform(k_b, (OUT,), jnp.float32, -bound, bound)
    x = jax.random.normal(k_x, (B, IN), jnp.float32)

    # One-time parameter prep (equivalent to module init).
    w_k, b_k = prepare_params(w, b)

    out = jax.block_until_ready(torchnet_forward(x, w_k, b_k))
    ref = x @ w.T + b
    assert out.shape == (B, OUT)
    assert jnp.allclose(out, ref, atol=1e-5, rtol=1e-5)

    # Exercise the batch-tiled grid path: multiple tiles + ragged last block.
    B2 = 40
    x2 = jax.random.normal(k_x, (B2, IN), jnp.float32)
    out2 = jax.block_until_ready(torchnet_forward(x2, w_k, b_k, block_b=16))
    ref2 = x2 @ w.T + b
    assert out2.shape == (B2, OUT)
    assert jnp.allclose(out2, ref2, atol=1e-5, rtol=1e-5)

    print("KERNEL_OK")
</pallas_src>

<mosaic_0001>
module attributes {stable_mosaic.version = 11 : i64} {
  func.func @linear_kernel(%arg0: i32, %arg1: memref<8x100xf32, #tpu.memory_space<vmem>>, %arg2: memref<100x10xf32, #tpu.memory_space<vmem>>, %arg3: memref<1x10xf32, #tpu.memory_space<vmem>>, %arg4: memref<8x10xf32, #tpu.memory_space<vmem>>) attributes {dimension_semantics = [#tpu.dimension_semantics<parallel>], iteration_bounds = array<i64: 1>, scalar_prefetch = 0 : i64, scratch_operands = 0 : i64, tpu.core_type = #tpu.core_type<tc>, window_params = [{transform_indices = @transform_0, window_bounds = array<i64: 8, 100>}, {pipeline_mode = #tpu.pipeline_mode<synchronous>, transform_indices = @transform_1, window_bounds = array<i64: 100, 10>}, {pipeline_mode = #tpu.pipeline_mode<synchronous>, transform_indices = @transform_2, window_bounds = array<i64: 1, 10>}, {transform_indices = @transform_3, window_bounds = array<i64: 8, 10>}]} {
    %c0 = arith.constant 0 : index
    %c0_0 = arith.constant 0 : index
    %0 = vector.load %arg1[%c0, %c0_0] : memref<8x100xf32, #tpu.memory_space<vmem>>, vector<8x100xf32>
    %c0_1 = arith.constant 0 : index
    %c0_2 = arith.constant 0 : index
    %1 = vector.load %arg2[%c0_1, %c0_2] : memref<100x10xf32, #tpu.memory_space<vmem>>, vector<100x10xf32>
    %cst = arith.constant dense<0.000000e+00> : vector<8x10xf32>
    %2 = tpu.matmul %0, %1, %cst {dimension_numbers = #tpu.dot_dimension_numbers<[1], [0], [0], [1], [0, 0, 1, 1], [], []>} : vector<8x100xf32>, vector<100x10xf32>, vector<8x10xf32> -> vector<8x10xf32>
    %c0_3 = arith.constant 0 : index
    %c0_4 = arith.constant 0 : index
    %3 = vector.load %arg3[%c0_3, %c0_4] : memref<1x10xf32, #tpu.memory_space<vmem>>, vector<1x10xf32>
    %4 = vector.broadcast %3 : vector<1x10xf32> to vector<8x10xf32>
    %5 = arith.addf %2, %4 : vector<8x10xf32>
    %c0_5 = arith.constant 0 : index
    %c0_6 = arith.constant 0 : index
    %6 = vector.load %arg4[%c0_5, %c0_6] : memref<8x10xf32, #tpu.memory_space<vmem>>, vector<8x10xf32>
    tpu.vector_store %arg4[%c0_5, %c0_6], %5 {strides = array<i32>} : memref<8x10xf32, #tpu.memory_space<vmem>>, vector<8x10xf32>,
    return
  }
  func.func @transform_0(%arg0: i32) -> (i32, i32) {
    %c0_i32 = arith.constant 0 : i32
    %c0_i32_0 = arith.constant 0 : i32
    return %arg0, %c0_i32 : i32, i32
  }
  func.func @transform_1(%arg0: i32) -> (i32, i32) {
    %c0_i32 = arith.constant 0 : i32
    %c0_i32_0 = arith.constant 0 : i32
    %c0_i32_1 = arith.constant 0 : i32
    return %c0_i32, %c0_i32_0 : i32, i32
  }
  func.func @transform_2(%arg0: i32) -> (i32, i32) {
    %c0_i32 = arith.constant 0 : i32
    %c0_i32_0 = arith.constant 0 : i32
    %c0_i32_1 = arith.constant 0 : i32
    return %c0_i32, %c0_i32_0 : i32, i32
  }
  func.func @transform_3(%arg0: i32) -> (i32, i32) {
    %c0_i32 = arith.constant 0 : i32
    %c0_i32_0 = arith.constant 0 : i32
    return %arg0, %c0_i32 : i32, i32
  }
}

</mosaic_0001>

<bundles_post_ra>
// kernel: tpu_custom_call.1
= control target key start
LH: loop header
LB: loop body
LE: loop exit
PB: predicated region body
PF: predicated region fallthrough
CT: control target
= control target key end

     0   :  { %v222_v3 = vmov 0.0|0.0   ;;  %vm223_vm0 = vmmov 0   ;;  %v224_v6 = vmov 0.0   ;;  %s303_s0 = inlined_call_operand.vmem [shape: f32[8,100], index: 0, kind: input, shape index: {}]   ;;  %s304_s1 = inlined_call_operand.vmem [shape: f32[100,10], index: 1, kind: input, shape index: {}]   ;;  %s305_s2 = inlined_call_operand.vmem [shape: f32[1,10], index: 2, kind: input, shape index: {}]   ;;  %s306_s3 = inlined_call_operand.hbm [shape: f32[8,10], index: 3, kind: output, shape index: {}]  }
   0x1   :  { %v16_v0 = vld [vmem:[%s304_s1] sm:$0xff]  ;;  %v17_v1 = vld [vmem:[%s304_s1 + $0x8] sm:$0xff]  ;;  %v18_v2 = vld [vmem:[%s304_s1 + $0x10] sm:$0xff]  ;;  %176 = vmatprep.subr.bf16.mxu0 %v222_v3  ;;  %173 = vmatprep.mubr.msk.f32.mxu0 %vm223_vm0, %v224_v6 }
   0x2   :  { %v177_v4 = vpack.c.bf16 %v17_v1, %v16_v0  ;;  %v19_v5 = vld [vmem:[%s304_s1 + $0x18] sm:$0xff]  ;;  %v20_v8 = vld [vmem:[%s304_s1 + $0x20] sm:$0xff]  ;;  %v21_v9 = vld [vmem:[%s304_s1 + $0x28] sm:$0xff] }
   0x3   :  { %v180_v7 = vpack.c.bf16 %v19_v5, %v18_v2 }
   0x4   :  { %178 = vmatpush3.bf16.msra.mxu0 %v177_v4 }
   0x5   :  { %179 = vmatprep.subr.bf16.mxu0 %v222_v3 }
   0x6   :  { %8 = vsyncpa [#allocation3], 0  ;;  %v183_v10 = vpack.c.bf16 %v21_v9, %v20_v8  ;;  %v22_v11 = vld [vmem:[%s304_s1 + $0x30] sm:$0xff]  ;;  %v23_v12 = vld [vmem:[%s304_s1 + $0x38] sm:$0xff]  ;;  %vm40_vm1 = vcmask 1043456   ;;  %vm36_vm2 = vcmask 818176  }
   0x7   :  { %v186_v13 = vpack.c.bf16 %v23_v12, %v22_v11  ;;  %v24_v14 = vld [vmem:[%s304_s1 + $0x40] sm:$0xff]  ;;  %v25_v15 = vld [vmem:[%s304_s1 + $0x48] sm:$0xff]  ;;  %v26_v17 = vld [vmem:[%s304_s1 + $0x50] sm:$0xff]  ;;  %s225_s15 = smov [#allocation2]   ;;  %vm114_vm3 = vcmask 80896  }
   0x8   :  { %181 = vmatpush3.bf16.msra.mxu0 %v180_v7  ;;  %v189_v16 = vpack.c.bf16 %v25_v15, %v24_v14  ;;  %v27_v18 = vld [vmem:[%s304_s1 + $0x58] sm:$0xff]  ;;  %v28_v20 = vld [vmem:[%s304_s1 + $0x60] sm:$0xf]  ;;  %s122_s16 = sshll.u32 %s225_s15, 4  ;;  %s123_s16 = int_to_ptr.vmem [resolvable:$true] %s122_s16 }
   0x9   :  { %182 = vmatprep.subr.bf16.mxu0 %v222_v3  ;;  %v192_v19 = vpack.c.bf16 %v27_v18, %v26_v17  ;;  %v15_v21 = vld [vmem:[%s303_s0] sm:$0xff]  ;;  %s198_s1 = scalar_lea.vmem %s123_s16, 128  ;;  %p203_p1 = scmp.lt.s32.totalorder %s123_s16, %s123_s16 }
   0xa   :  { %v130_v22 = vld [vmem:[%s305_s2] ss:$0 sm:$0xff]  ;;  %p199_p0 = scmp.ne.s32.totalorder %s123_s16, %s198_s1  ;;  %p204_p2 = scmp.lt.s32.totalorder %s198_s1, %s198_s1 }
   0xc   :  { %184 = vmatpush3.bf16.msra.mxu0 %v183_v10  ;;  %p205_p3 = por %p204_p2, %p203_p1 }
   0xd   :  { %185 = vmatprep.subr.bf16.mxu0 %v222_v3 }
   0xe   :  { %p206_p4 = pnand %p205_p3, %p199_p0 }
  0x10   :  { %187 = vmatpush3.bf16.msra.mxu0 %v186_v13 }
  0x11   :  { %188 = vmatprep.subr.bf16.mxu0 %v222_v3 }
  0x14   :  { %190 = vmatpush3.bf16.msra.mxu0 %v189_v16 }
  0x15   :  { %191 = vmatprep.subr.bf16.mxu0 %v222_v3 }
  0x18   :  { %193 = vmatpush3.bf16.msra.mxu0 %v192_v19 }
  0x19   :  { %171 = vmatprep.subr.mxu0 %v224_v6 }
  0x1c   :  { %172 = vmatpush3.msk.msra.mxu0 %vm40_vm1, %v28_v20 }
  0x1d   :  { %174 = vmatmul.mubr.msk.f32.vlgmr.msra.gmra.mrb[0].mxu0 %vm36_vm2, %v15_v21 }
  0xf0   :  { %v110_v23 = vpop.f32.mrb[0].mxu0 }
  0xf1   :  { %v111_v24 = vadd.f32 %v130_v22, %v110_v23  ;;  %v175_v25 = vpop.f32.mrb[1].mxu0 }
  0xf3   :  { %115 = vst.msk [vmem:[#allocation2] sm:$0xff] %vm114_vm3, %v111_v24 }
  0xf4   :  { %209 = shalt.err (!%p206_p4)
}
  0xf5   :  { %s210_s18 = scalar_lea.hbm %s306_s3, 128 }
  0xf6   :  { %p211_p5 = scmp.ne.s32.totalorder %s306_s3, %s210_s18  ;;  %p214_p6 = scmp.lt.u32.totalorder %s210_s18, %s306_s3 }
  0xf8   :  { %p216_p7 = pnand %p214_p6, %p211_p5 }
  0xfa   :  { %219 = shalt.err (!%p216_p7)
}
  0xfb   :  { %125 = dma.vmem_to_hbm [thread:$0]  %s123_s16, 128, %s306_s3, [#allocation3]  }
  0xfc   :  { %220 = dma.done.wait [#allocation3], 128  }
  0xfd   :  { %221 = vsyncadd [#allocation3], 4294967168 }
  0xfe   :  { %129 = vsyncpa [#allocation3], 1 }

</bundles_post_ra>
